<compile_context>
chip_gen: v7x
topology: tpu7x:2x2x1
jax: 0.10.0
libtpu: 0.0.40
codegen_flags: <defaults>
</compile_context>

<pallas_src>
import functools

import jax
import jax.numpy as jnp
from jax.experimental import pallas as pl
from jax.experimental.pallas import tpu as pltpu

LANE = 128
TARGET_TILE_ROWS = 2048  # 2048 x 128 x 4B = 1 MiB per f32 block


def _dropout_kernel(tile_rows, threshold, seed_ref, x_ref, o_ref):
    """Elementwise dropout on one (tile_rows, LANE) block.

    Random bits come from a counter-based hash (murmur3 fmix32) of the global
    element index mixed with the seed.  All arithmetic is int32 (wrapping),
    with logical right shifts, so it runs on the VPU and in interpret mode.
    """
    shape = x_ref.shape
    row = jax.lax.broadcasted_iota(jnp.int32, shape, 0)
    col = jax.lax.broadcasted_iota(jnp.int32, shape, 1)
    base = pl.program_id(0) * tile_rows
    flat = (base + row) * shape[1] + col            # global element index

    # seed * 0x9E3779B9 (golden-ratio constant, as signed int32)
    h = flat + seed_ref[0] * jnp.int32(-1640531527)
    # murmur3 fmix32 avalanche finalizer
    h = h ^ jax.lax.shift_right_logical(h, 16)
    h = h * jnp.int32(-2048144789)                  # 0x85EBCA6B
    h = h ^ jax.lax.shift_right_logical(h, 13)
    h = h * jnp.int32(-1028477387)                  # 0xC2B2AE35
    h = h ^ jax.lax.shift_right_logical(h, 16)

    # h is ~uniform over all 32-bit patterns; P(h < threshold) == keep_prob
    # when threshold = round(keep_prob * 2^32) - 2^31 (signed compare).
    keep = h < jnp.int32(threshold)
    xv = x_ref[...]
    o_ref[...] = jnp.where(keep, xv, jnp.zeros_like(xv))


def dropout_forward(x, p=0.5, seed=0, training=True):
    """Pallas TPU dropout matching the PyTorch module's forward (no rescale)."""
    if not training:
        return x
    p = float(p)
    if p <= 0.0:
        return x              # bernoulli(1) == 1 everywhere -> identity
    if p >= 1.0:
        return jnp.zeros_like(x)

    keep_prob = 1.0 - p
    # Signed threshold such that P(hash < threshold) == keep_prob.
    threshold_u = int(round(keep_prob * 4294967296.0))
    threshold_u = max(1, min(threshold_u, 4294967295))
    threshold = threshold_u - 2147483648

    orig_shape = x.shape
    total = x.size

    # Lane-dense 2-D slab.  Contiguous reshape is free; pad only if the
    # element count is not a multiple of 128 (rare for CNN activations).
    pad = (-total) % LANE
    if pad == 0:
        x2d = x.reshape(total // LANE, LANE)
    else:
        x2d = jnp.pad(x.reshape(-1), (0, pad)).reshape(-1, LANE)
    rows = x2d.shape[0]

    # Tile selection: single full-extent block for small slabs (no (8,128)
    # alignment requirement when the block equals the array), otherwise
    # ~1 MiB blocks with a cdiv grid (last block is masked by Pallas).
    if rows <= TARGET_TILE_ROWS:
        tile_rows = rows
        grid = (1,)
    else:
        tile_rows = TARGET_TILE_ROWS
        grid = (pl.cdiv(rows, tile_rows),)

    seed_arr = jnp.asarray([seed], dtype=jnp.int32)

    out2d = pl.pallas_call(
        functools.partial(_dropout_kernel, tile_rows, threshold),
        out_shape=jax.ShapeDtypeStruct((rows, LANE), x.dtype),
        grid_spec=pltpu.PrefetchScalarGridSpec(
            num_scalar_prefetch=1,
            grid=grid,
            in_specs=[pl.BlockSpec((tile_rows, LANE), lambda i, seed: (i, 0))],
            out_specs=pl.BlockSpec((tile_rows, LANE), lambda i, seed: (i, 0)),
        ),
        compiler_params=pltpu.CompilerParams(
            dimension_semantics=("parallel",),
        ),
    )(seed_arr, x2d)

    if pad:
        return out2d.reshape(-1)[:total].reshape(orig_shape)
    return out2d.reshape(orig_shape)


if __name__ == "__main__":
    key = jax.random.PRNGKey(0)
    # Small NCHW input consistent with a CIFAR-style CNN activation.
    x = jax.random.normal(key, (2, 4, 16, 16), dtype=jnp.float32)

    p = 0.5
    out = dropout_forward(x, p=p, seed=0, training=True)
    out = jax.block_until_ready(out)

    # Sanity checks: shape/dtype preserved, every element either kept exactly
    # or zeroed (no 1/(1-p) rescale in this module), keep rate ~ (1 - p).
    assert out.shape == x.shape and out.dtype == x.dtype
    kept_or_zero = jnp.logical_or(out == x, out == 0.0)
    assert bool(jnp.all(kept_or_zero))
    keep_frac = float(jnp.mean((out == x) & (x != 0.0)))
    assert 0.3 < keep_frac < 0.7, keep_frac  # loose check around keep_prob = 0.5

    # Eval mode: identity.
    out_eval = jax.block_until_ready(dropout_forward(x, p=p, training=False))
    assert bool(jnp.all(out_eval == x))

    print("KERNEL_OK")
</pallas_src>

<mosaic_0001>
module attributes {stable_mosaic.version = 11 : i64} {
  func.func @_dropout_kernel(%arg0: i32, %arg1: memref<1xi32, #tpu.memory_space<smem>>, %arg2: memref<16x128xf32, #tpu.memory_space<vmem>>, %arg3: memref<16x128xf32, #tpu.memory_space<vmem>>) attributes {dimension_semantics = [#tpu.dimension_semantics<parallel>], iteration_bounds = array<i64: 1>, scalar_prefetch = 1 : i64, scratch_operands = 0 : i64, tpu.core_type = #tpu.core_type<tc>, window_params = [{transform_indices = @transform_0, window_bounds = array<i64: 16, 128>}, {transform_indices = @transform_1, window_bounds = array<i64: 16, 128>}]} {
    %0 = tpu.iota {dimensions = array<i32: 0>} : vector<16x128xi32>
    %1 = tpu.iota {dimensions = array<i32: 1>} : vector<16x128xi32>
    %c16_i32 = arith.constant 16 : i32
    %2 = arith.muli %arg0, %c16_i32 : i32
    %3 = vector.broadcast %2 : i32 to vector<16x128xi32>
    %4 = arith.addi %3, %0 : vector<16x128xi32>
    %c128_i32 = arith.constant 128 : i32
    %5 = vector.broadcast %c128_i32 : i32 to vector<16x128xi32>
    %6 = arith.muli %4, %5 : vector<16x128xi32>
    %7 = arith.addi %6, %1 : vector<16x128xi32>
    %c0 = arith.constant 0 : index
    %8 = memref.load %arg1[%c0] : memref<1xi32, #tpu.memory_space<smem>>
    %c-1640531527_i32 = arith.constant -1640531527 : i32
    %9 = arith.muli %8, %c-1640531527_i32 : i32
    %10 = vector.broadcast %9 : i32 to vector<16x128xi32>
    %11 = arith.addi %7, %10 : vector<16x128xi32>
    %c16_i32_0 = arith.constant 16 : i32
    %12 = vector.broadcast %c16_i32_0 : i32 to vector<16x128xi32>
    %13 = arith.shrui %11, %12 : vector<16x128xi32>
    %14 = arith.xori %11, %13 : vector<16x128xi32>
    %c-2048144789_i32 = arith.constant -2048144789 : i32
    %15 = vector.broadcast %c-2048144789_i32 : i32 to vector<16x128xi32>
    %16 = arith.muli %14, %15 : vector<16x128xi32>
    %c13_i32 = arith.constant 13 : i32
    %17 = vector.broadcast %c13_i32 : i32 to vector<16x128xi32>
    %18 = arith.shrui %16, %17 : vector<16x128xi32>
    %19 = arith.xori %16, %18 : vector<16x128xi32>
    %c-1028477387_i32 = arith.constant -1028477387 : i32
    %20 = vector.broadcast %c-1028477387_i32 : i32 to vector<16x128xi32>
    %21 = arith.muli %19, %20 : vector<16x128xi32>
    %c16_i32_1 = arith.constant 16 : i32
    %22 = vector.broadcast %c16_i32_1 : i32 to vector<16x128xi32>
    %23 = arith.shrui %21, %22 : vector<16x128xi32>
    %24 = arith.xori %21, %23 : vector<16x128xi32>
    %c0_i32 = arith.constant 0 : i32
    %25 = vector.broadcast %c0_i32 : i32 to vector<16x128xi32>
    %26 = arith.cmpi slt, %24, %25 : vector<16x128xi32>
    %c0_2 = arith.constant 0 : index
    %c0_3 = arith.constant 0 : index
    %27 = vector.load %arg2[%c0_2, %c0_3] : memref<16x128xf32, #tpu.memory_space<vmem>>, vector<16x128xf32>
    %cst = arith.constant 0.000000e+00 : f32
    %28 = vector.broadcast %cst : f32 to vector<16x128xf32>
    %29 = arith.select %26, %27, %28 : vector<16x128xi1>, vector<16x128xf32>
    %c0_4 = arith.constant 0 : index
    %c0_5 = arith.constant 0 : index
    %30 = vector.load %arg3[%c0_4, %c0_5] : memref<16x128xf32, #tpu.memory_space<vmem>>, vector<16x128xf32>
    tpu.vector_store %arg3[%c0_4, %c0_5], %29 {strides = array<i32>} : memref<16x128xf32, #tpu.memory_space<vmem>>, vector<16x128xf32>,
    return
  }
  func.func @transform_0(%arg0: i32, %arg1: memref<1xi32, #tpu.memory_space<smem>>) -> (i32, i32) {
    %c0_i32 = arith.constant 0 : i32
    %c0_i32_0 = arith.constant 0 : i32
    return %arg0, %c0_i32 : i32, i32
  }
  func.func @transform_1(%arg0: i32, %arg1: memref<1xi32, #tpu.memory_space<smem>>) -> (i32, i32) {
    %c0_i32 = arith.constant 0 : i32
    %c0_i32_0 = arith.constant 0 : i32
    return %arg0, %c0_i32 : i32, i32
  }
}

</mosaic_0001>

<bundles_post_ra>
// kernel: tpu_custom_call.1
= control target key start
LH: loop header
LB: loop body
LE: loop exit
PB: predicated region body
PF: predicated region fallthrough
CT: control target
= control target key end

     0   :  { %8 = vsyncpa [#allocation5], 0  ;;  %s188_s0 = inlined_call_operand.<no memory space> [shape: s32[1], index: 0, kind: input, shape index: {}]   ;;  %s189_s1 = inlined_call_operand.hbm [shape: f32[16,128], index: 1, kind: input, shape index: {}]   ;;  %s190_s2 = inlined_call_operand.hbm [shape: f32[16,128], index: 2, kind: output, shape index: {}]  }
   0x1   :  { %9 = vsyncpa [#allocation6], 0  ;;  %s136_s9 = smov [#allocation4]   ;;  %s88_s13 = scalar_lea.hbm %s189_s1, 256 }
   0x2   :  { %s15_s10 = sshll.u32 %s136_s9, 4  ;;  %p89_p0 = scmp.ne.s32.totalorder %s189_s1, %s88_s13  ;;  %s16_s10 = int_to_ptr.vmem [resolvable:$true] %s15_s10 }
   0x3   :  { %p92_p1 = scmp.lt.u32.totalorder %s88_s13, %s189_s1 }
   0x5   :  { %p94_p2 = pnand %p92_p1, %p89_p0 }
   0x7   :  { %97 = shalt.err (!%p94_p2)
}
   0x8   :  { %s98_s18 = scalar_lea.vmem %s16_s10, 256  ;;  %p103_p4 = scmp.lt.s32.totalorder %s16_s10, %s16_s10 }
   0x9   :  { %p99_p3 = scmp.ne.s32.totalorder %s16_s10, %s98_s18  ;;  %p104_p5 = scmp.lt.s32.totalorder %s98_s18, %s98_s18 }
   0xb   :  { %p105_p6 = por %p104_p5, %p103_p4 }
   0xd   :  { %p106_p7 = pnand %p105_p6, %p99_p3 }
   0xf   :  { %109 = shalt.err (!%p106_p7)
}
  0x10   :  { %s137_s19 = smov 128   ;;  %s138_s20 = smov 8  }
  0x11   :  { %21 = dma.hbm_to_vmem [thread:$0]  %s189_s1, 256, %s16_s10, [#allocation5], %s137_s19, %s137_s19, %s138_s20  }
  0x12   :  { %132 = dma.done.wait [#allocation5], 256  }
  0x13   :  { %133 = vsyncadd [#allocation5], 4294967040  ;;  %v25_v0 = vlaneseq  ;;  %s39_s25 = smul.u32 2654435769, %s188_s0  ;;  %v61_v25 = vld [vmem:[#allocation4] sm:$0xff]  ;;  %s139_s0 = smov [#allocation7]  }
  0x14   :  { %s72_s1 = sshll.u32 %s139_s0, 4  ;;  %v62_v28 = vld [vmem:[#allocation4 + $0x8] sm:$0xff]  ;;  %s73_s1 = int_to_ptr.vmem [resolvable:$true] %s72_s1 }
  0x15   :  { %v26_v1 = vshrl.u32 %v25_v0, 7  ;;  %v29_v2 = vand.u32 127, %v25_v0  ;;  %v40_v5 = vstv %s39_s25  ;;  %s110_s26 = scalar_lea.vmem %s73_s1, 256  ;;  %p115_p9 = scmp.lt.s32.totalorder %s73_s1, %s73_s1 }
  0x16   :  { %p111_p8 = scmp.ne.s32.totalorder %s73_s1, %s110_s26  ;;  %p116_p10 = scmp.lt.s32.totalorder %s110_s26, %s110_s26 }
  0x17   :  { %v34_v3 = vmul.u32 128, %v26_v1  ;;  %v27_v4 = vadd.s32 8, %v26_v1 }
  0x18   :  { %p117_p11 = por %p116_p10, %p115_p9 }
  0x19   :  { %v36_v6 = vadd.s32 %v34_v3, %v29_v2  ;;  %v35_v7 = vmul.u32 128, %v27_v4 }
  0x1a   :  { %p118_p12 = pnand %p117_p11, %p111_p8 }
  0x1b   :  { %v41_v8 = vadd.s32 %v40_v5, %v36_v6  ;;  %v37_v9 = vadd.s32 %v35_v7, %v29_v2 }
  0x1d   :  { %v43_v10 = vshrl.u32 %v41_v8, 16  ;;  %v42_v11 = vadd.s32 %v40_v5, %v37_v9 }
  0x1f   :  { %v45_v12 = vxor.u32 %v43_v10, %v41_v8  ;;  %v44_v13 = vshrl.u32 %v42_v11, 16 }
  0x21   :  { %v47_v14 = vmul.u32 2246822507, %v45_v12  ;;  %v46_v15 = vxor.u32 %v44_v13, %v42_v11 }
  0x23   :  { %v49_v16 = vshrl.u32 %v47_v14, 13  ;;  %v48_v17 = vmul.u32 2246822507, %v46_v15 }
  0x25   :  { %v51_v18 = vxor.u32 %v49_v16, %v47_v14  ;;  %v50_v19 = vshrl.u32 %v48_v17, 13 }
  0x27   :  { %v53_v20 = vmul.u32 3266489909, %v51_v18  ;;  %v52_v21 = vxor.u32 %v50_v19, %v48_v17 }
  0x29   :  { %v55_v22 = vshrl.u32 %v53_v20, 16  ;;  %v54_v23 = vmul.u32 3266489909, %v52_v21 }
  0x2b   :  { %v57_v24 = vxor.u32 %v55_v22, %v53_v20  ;;  %v56_v26 = vshrl.u32 %v54_v23, 16 }
  0x2d   :  { %vm59_vm0 = vcmp.lt.s32.totalorder %v57_v24, 0  ;;  %v58_v27 = vxor.u32 %v56_v26, %v54_v23 }
  0x2e   :  { %v63_v29 = vsel %vm59_vm0, %v61_v25, 0.0 }
  0x2f   :  { %65 = vst [vmem:[#allocation7] sm:$0xff] %v63_v29  ;;  %vm60_vm1 = vcmp.lt.s32.totalorder %v58_v27, 0 }
  0x30   :  { %v64_v30 = vsel %vm60_vm1, %v62_v28, 0.0 }
  0x31   :  { %66 = vst [vmem:[#allocation7 + $0x8] sm:$0xff] %v64_v30 }
  0x32   :  { %121 = shalt.err (!%p118_p12)
}
  0x33   :  { %s122_s29 = scalar_lea.hbm %s190_s2, 256 }
  0x34   :  { %p123_p13 = scmp.ne.s32.totalorder %s190_s2, %s122_s29  ;;  %p126_p0 = scmp.lt.u32.totalorder %s122_s29, %s190_s2 }
  0x36   :  { %p128_p1 = pnand %p126_p0, %p123_p13 }
  0x38   :  { %131 = shalt.err (!%p128_p1)
}
  0x39   :  { %78 = dma.vmem_to_hbm [thread:$0]  %s73_s1, 256, %s190_s2, [#allocation6], %s137_s19, %s137_s19, %s138_s20  }
  0x3a   :  { %134 = dma.done.wait [#allocation6], 256  }
  0x3b   :  { %135 = vsyncadd [#allocation6], 4294967040 }
  0x3c   :  { %82 = vsyncpa [#allocation5], 1 }
  0x3d   :  { %83 = vsyncpa [#allocation6], 1 }

</bundles_post_ra>
